<compile_context>
chip_gen: v6e
topology: v6e:2x2x1
jax: 0.10.0
libtpu: 0.0.40
codegen_flags: <defaults>
</compile_context>

<pallas_src>
import functools

import jax
import jax.numpy as jnp
from jax.experimental import pallas as pl
from jax.experimental.pallas import tpu as pltpu


def _round_up(n, m):
    return ((n + m - 1) // m) * m


def _cdiv(a, b):
    return -(-a // b)


@functools.lru_cache(maxsize=None)
def _vmem_capacity_bytes():
    """Per-core VMEM capacity (v5e/v6e: 128 MiB, v7x: 64 MiB)."""
    try:
        return int(pltpu.get_tpu_info().vmem_capacity_bytes)
    except Exception:
        return 64 * 1024 * 1024            # conservative fallback (v7x-sized)


@functools.lru_cache(maxsize=None)
def _device_kind():
    try:
        return jax.devices()[0].device_kind.lower()
    except Exception:
        return ""


# ---------------------------------------------------------------------------
# Kernels
# ---------------------------------------------------------------------------
def _residual_mlp_direct_kernel(x_ref, w1_ref, b1_ref, w2_ref, b2_ref, o_ref,
                                *, gelu_dtype):
    """Whole H at once, weights resident: no scratch accumulator, one store."""
    x = x_ref[...]                                 # original dtype (e.g. f32)
    xc = x.astype(w1_ref.dtype)                    # in-kernel cast, hidden
    h = jnp.dot(xc, w1_ref[...], preferred_element_type=jnp.float32)
    # tanh-approximate GELU (EUP slot).  bf16 on v6e/v7x, f32 on v5e.
    h = jax.nn.gelu((h + b1_ref[...]).astype(gelu_dtype))
    y = jnp.dot(h.astype(w2_ref.dtype), w2_ref[...],
                preferred_element_type=jnp.float32)
    # Residual uses the exact (un-quantized) x.
    o_ref[...] = (y + b2_ref[...] + x.astype(jnp.float32)).astype(o_ref.dtype)


def _residual_mlp_streamed_kernel(x_ref, w1_ref, b1_ref, w2_ref, b2_ref,
                                  o_ref, acc_ref, *, gelu_dtype):
    """H tiled along an inner 'arbitrary' grid axis; weight slices streamed."""
    k = pl.program_id(1)
    x = x_ref[...]

    @pl.when(k == 0)
    def _():
        # Residual + output bias folded into the accumulator init.
        acc_ref[...] = x.astype(jnp.float32) + b2_ref[...]

    xc = x.astype(w1_ref.dtype)
    h = jnp.dot(xc, w1_ref[...], preferred_element_type=jnp.float32)
    h = jax.nn.gelu((h + b1_ref[...]).astype(gelu_dtype))
    acc_ref[...] += jnp.dot(h.astype(w2_ref.dtype), w2_ref[...],
                            preferred_element_type=jnp.float32)

    @pl.when(k == pl.num_programs(1) - 1)
    def _():
        o_ref[...] = acc_ref[...].astype(o_ref.dtype)


# ---------------------------------------------------------------------------
# Wrappers
# ---------------------------------------------------------------------------
def prepare_params(w1, b1, w2, b2, compute_dtype=jnp.bfloat16):
    """One-time parameter prep (call once, NOT per forward step).

    Weights are stored in the compute dtype so there is no per-call HBM cast
    pass; biases stay f32 and are pre-shaped to (1, H) / (1, D).
    """
    return (jnp.asarray(w1, dtype=compute_dtype),
            jnp.asarray(b1, dtype=jnp.float32).reshape(1, -1),
            jnp.asarray(w2, dtype=compute_dtype),
            jnp.asarray(b2, dtype=jnp.float32).reshape(1, -1))


@functools.partial(jax.jit, static_argnames=("tile_rows", "h_block"))
def residual_mlp(x, w1, b1, w2, b2, *, tile_rows=None, h_block=None):
    """Fused Residual(MLP) forward: GELU(x @ w1 + b1) @ w2 + b2 + x.

    x: [B, S, D].  w1: [D, H], w2: [H, D] in the desired *compute* dtype
    (pass bf16 weights from prepare_params() for the fast path; the x -> bf16
    cast happens inside the kernel).  Biases may be [H]/[D] or [1,H]/[1,D].
    """
    B, S, D = x.shape
    H = w1.shape[1]
    N = B * S
    out_dtype = x.dtype
    compute_dtype = w1.dtype

    xbytes = jnp.dtype(x.dtype).itemsize
    obytes = jnp.dtype(out_dtype).itemsize
    cbytes = jnp.dtype(compute_dtype).itemsize

    # GELU chain in bf16 on v6e/v7x (bf16 VALU/EUP); keep f32 on v5e.
    if (jnp.dtype(compute_dtype) == jnp.dtype(jnp.bfloat16)
            and "v5" not in _device_kind()):
        gelu_dtype = jnp.bfloat16
    else:
        gelu_dtype = jnp.float32

    # --- static tiling decisions -------------------------------------------
    if tile_rows is None:
        # Target >= 8 row tiles (pipelining + both v7x cores); cap at 512 rows
        # to amortize the ~0.35us/step overhead at large N.
        tile_rows = min(512, max(32, _round_up(_cdiv(N, 8), 16)))
    tile_rows = max(16, min(tile_rows, _round_up(N, 16)))

    vmem_budget = max(_vmem_capacity_bytes() - 12 * 1024 * 1024,
                      24 * 1024 * 1024)

    io_bytes = 2 * tile_rows * D * (xbytes + obytes)    # x/out, double-buffered

    def _direct_need():
        return (io_bytes
                + 2 * D * H * cbytes                    # w1+w2 resident (1 buf)
                + (H + D) * 4                           # biases (f32)
                + tile_rows * H * (4 + cbytes)          # h (f32 + compute copy)
                + tile_rows * D * 4)                    # f32 y before store

    def _streamed_need(hb):
        return (io_bytes
                + 4 * D * hb * cbytes                   # w1/w2 slices, 2 bufs
                + 2 * hb * 4 + D * 4                    # b1 slices + b2
                + tile_rows * D * 4                     # f32 accumulator
                + tile_rows * hb * (4 + cbytes))        # h intermediate

    use_direct = (h_block is None and H <= 2048
                  and _direct_need() * 3 // 2 + (4 << 20) <= vmem_budget)

    if not use_direct and h_block is None:
        # Largest lane-aligned (multiple of 128) slice of H that divides it
        # and fits the VMEM budget; fall back to the full H otherwise.
        h_block = H
        for cand in (2048, 1024, 512, 256, 128):
            if H % cand == 0 and (
                    _streamed_need(cand) * 3 // 2 + (4 << 20) <= vmem_budget):
                h_block = cand
                break

    b1_2d = b1.reshape(1, H).astype(jnp.float32)   # biases stay f32 (tiny)
    b2_2d = b2.reshape(1, D).astype(jnp.float32)
    xf = x.reshape(N, D)                           # NO dtype cast here

    n_row = _cdiv(N, tile_rows)

    if use_direct:
        need = _direct_need()
        vmem_limit = int(min(vmem_budget, need * 3 // 2 + (4 << 20)))
        cost = pl.CostEstimate(
            flops=4 * N * D * H,
            transcendentals=N * H,
            bytes_accessed=(N * D * (xbytes + obytes)
                            + 2 * D * H * cbytes + (H + D) * 4))
        out = pl.pallas_call(
            functools.partial(_residual_mlp_direct_kernel,
                              gelu_dtype=gelu_dtype),
            out_shape=jax.ShapeDtypeStruct((N, D), out_dtype),
            grid_spec=pltpu.PrefetchScalarGridSpec(
                num_scalar_prefetch=0,
                grid=(n_row,),
                in_specs=[
                    pl.BlockSpec((tile_rows, D), lambda i: (i, 0)),
                    # Grid-invariant operands: single-buffer them.
                    pl.BlockSpec((D, H), lambda i: (0, 0),
                                 pipeline_mode=pl.Buffered(1)),
                    pl.BlockSpec((1, H), lambda i: (0, 0),
                                 pipeline_mode=pl.Buffered(1)),
                    pl.BlockSpec((H, D), lambda i: (0, 0),
                                 pipeline_mode=pl.Buffered(1)),
                    pl.BlockSpec((1, D), lambda i: (0, 0),
                                 pipeline_mode=pl.Buffered(1)),
                ],
                out_specs=pl.BlockSpec((tile_rows, D), lambda i: (i, 0)),
            ),
            compiler_params=pltpu.CompilerParams(
                dimension_semantics=("parallel",),
                vmem_limit_bytes=vmem_limit,
            ),
            cost_estimate=cost,
        )(xf, w1, b1_2d, w2, b2_2d)
    else:
        assert H % h_block == 0, "h_block must divide H"
        assert h_block % 128 == 0 or h_block == H, (
            "h_block must be a multiple of 128 (lane width) or equal H")
        need = _streamed_need(h_block)
        vmem_limit = int(min(vmem_budget, need * 3 // 2 + (4 << 20)))
        cost = pl.CostEstimate(
            flops=4 * N * D * H,
            transcendentals=N * H,
            bytes_accessed=(N * D * (xbytes + obytes)
                            + n_row * 2 * D * H * cbytes + (H + D) * 4))
        out = pl.pallas_call(
            functools.partial(_residual_mlp_streamed_kernel,
                              gelu_dtype=gelu_dtype),
            out_shape=jax.ShapeDtypeStruct((N, D), out_dtype),
            grid_spec=pltpu.PrefetchScalarGridSpec(
                num_scalar_prefetch=0,
                grid=(n_row, H // h_block),          # reduction axis last
                in_specs=[
                    pl.BlockSpec((tile_rows, D), lambda i, k: (i, 0)),
                    pl.BlockSpec((D, h_block), lambda i, k: (0, k)),
                    pl.BlockSpec((1, h_block), lambda i, k: (0, k)),
                    pl.BlockSpec((h_block, D), lambda i, k: (k, 0)),
                    pl.BlockSpec((1, D), lambda i, k: (0, 0)),
                ],
                out_specs=pl.BlockSpec((tile_rows, D), lambda i, k: (i, 0)),
                scratch_shapes=[pltpu.VMEM((tile_rows, D), jnp.float32)],
            ),
            compiler_params=pltpu.CompilerParams(
                dimension_semantics=("parallel", "arbitrary"),
                vmem_limit_bytes=vmem_limit,
            ),
            cost_estimate=cost,
        )(xf, w1, b1_2d, w2, b2_2d)

    return out.reshape(B, S, D)


def _reference(x, w1, b1, w2, b2):
    h = jax.nn.gelu(jnp.einsum("bsd,dh->bsh", x, w1) + b1)
    y = jnp.einsum("bsh,hd->bsd", h, w2) + b2
    return y + x


if __name__ == "__main__":
    # Small, lane-friendly demo shapes: D, H multiples of 128 so MXU tiles and
    # stores are unmasked; N = B*S = 128 rows -> a multi-step "parallel" grid.
    B, S, D, H = 2, 64, 128, 256

    key = jax.random.PRNGKey(0)
    kx, k1, k2 = jax.random.split(key, 3)
    x = jax.random.normal(kx, (B, S, D), dtype=jnp.float32)
    # Deterministic synthetic parameters (not loaded from a checkpoint).
    w1 = jax.random.normal(k1, (D, H), dtype=jnp.float32) * (1.0 / D ** 0.5)
    b1 = jnp.zeros((H,), dtype=jnp.float32)
    w2 = jax.random.normal(k2, (H, D), dtype=jnp.float32) * (1.0 / H ** 0.5)
    b2 = jnp.zeros((D,), dtype=jnp.float32)

    ref = _reference(x, w1, b1, w2, b2)

    # 1) f32 compute path (weights left in f32) -> direct (no-chunk) kernel.
    out_f32 = jax.block_until_ready(residual_mlp(x, w1, b1, w2, b2))
    assert out_f32.shape == (B, S, D)
    assert jnp.allclose(out_f32, ref, atol=1e-4, rtol=1e-4)

    # 2) f32 compute, forced weight-streaming path (inner grid axis over H):
    #    exercises the large-H / v7x code path at small shapes.
    out_stream = jax.block_until_ready(
        residual_mlp(x, w1, b1, w2, b2, h_block=128))
    assert out_stream.shape == (B, S, D)
    assert jnp.allclose(out_stream, ref, atol=1e-4, rtol=1e-4)

    # 3) Fast path: weights pre-cast to bf16 ONCE (outside the per-call jit),
    #    x cast to bf16 inside the kernel, f32 MXU accumulation, exact-f32
    #    residual. Looser tolerance reflects bf16 quantization of x/w1/w2/h.
    w1c, b1c, w2c, b2c = prepare_params(w1, b1, w2, b2, jnp.bfloat16)
    out_bf16 = jax.block_until_ready(residual_mlp(x, w1c, b1c, w2c, b2c))
    assert out_bf16.shape == (B, S, D)
    assert jnp.allclose(out_bf16, ref, atol=1e-1, rtol=5e-2)

    print("KERNEL_OK")
</pallas_src>

<mosaic_0001>
module attributes {stable_mosaic.version = 11 : i64} {
  func.func @_residual_mlp_direct_kernel(%arg0: i32, %arg1: memref<32x128xf32, #tpu.memory_space<vmem>>, %arg2: memref<128x256xf32, #tpu.memory_space<vmem>>, %arg3: memref<1x256xf32, #tpu.memory_space<vmem>>, %arg4: memref<256x128xf32, #tpu.memory_space<vmem>>, %arg5: memref<1x128xf32, #tpu.memory_space<vmem>>, %arg6: memref<32x128xf32, #tpu.memory_space<vmem>>) attributes {dimension_semantics = [#tpu.dimension_semantics<parallel>], iteration_bounds = array<i64: 4>, scalar_prefetch = 0 : i64, scratch_operands = 0 : i64, tpu.core_type = #tpu.core_type<tc>, window_params = [{transform_indices = @transform_0, window_bounds = array<i64: 32, 128>}, {pipeline_mode = #tpu.pipeline_mode<synchronous>, transform_indices = @transform_1, window_bounds = array<i64: 128, 256>}, {pipeline_mode = #tpu.pipeline_mode<synchronous>, transform_indices = @transform_2, window_bounds = array<i64: 1, 256>}, {pipeline_mode = #tpu.pipeline_mode<synchronous>, transform_indices = @transform_3, window_bounds = array<i64: 256, 128>}, {pipeline_mode = #tpu.pipeline_mode<synchronous>, transform_indices = @transform_4, window_bounds = array<i64: 1, 128>}, {transform_indices = @transform_5, window_bounds = array<i64: 32, 128>}]} {
    %c0 = arith.constant 0 : index
    %c0_0 = arith.constant 0 : index
    %0 = vector.load %arg1[%c0, %c0_0] : memref<32x128xf32, #tpu.memory_space<vmem>>, vector<32x128xf32>
    %c0_1 = arith.constant 0 : index
    %c0_2 = arith.constant 0 : index
    %1 = vector.load %arg2[%c0_1, %c0_2] : memref<128x256xf32, #tpu.memory_space<vmem>>, vector<128x256xf32>
    %cst = arith.constant dense<0.000000e+00> : vector<32x256xf32>
    %2 = tpu.matmul %0, %1, %cst {dimension_numbers = #tpu.dot_dimension_numbers<[1], [0], [0], [1], [0, 0, 1, 1], [], []>} : vector<32x128xf32>, vector<128x256xf32>, vector<32x256xf32> -> vector<32x256xf32>
    %c0_3 = arith.constant 0 : index
    %c0_4 = arith.constant 0 : index
    %3 = vector.load %arg3[%c0_3, %c0_4] : memref<1x256xf32, #tpu.memory_space<vmem>>, vector<1x256xf32>
    %4 = vector.broadcast %3 : vector<1x256xf32> to vector<32x256xf32>
    %5 = arith.addf %2, %4 : vector<32x256xf32>
    %6 = arith.mulf %5, %5 : vector<32x256xf32>
    %7 = arith.mulf %5, %6 : vector<32x256xf32>
    %cst_5 = arith.constant 4.471500e-02 : f32
    %8 = vector.broadcast %cst_5 : f32 to vector<32x256xf32>
    %9 = arith.mulf %8, %7 : vector<32x256xf32>
    %10 = arith.addf %5, %9 : vector<32x256xf32>
    %cst_6 = arith.constant 0.797884583 : f32
    %11 = vector.broadcast %cst_6 : f32 to vector<32x256xf32>
    %12 = arith.mulf %11, %10 : vector<32x256xf32>
    %13 = math.tanh %12 : vector<32x256xf32>
    %cst_7 = arith.constant 1.000000e+00 : f32
    %14 = vector.broadcast %cst_7 : f32 to vector<32x256xf32>
    %15 = arith.addf %14, %13 : vector<32x256xf32>
    %cst_8 = arith.constant 5.000000e-01 : f32
    %16 = vector.broadcast %cst_8 : f32 to vector<32x256xf32>
    %17 = arith.mulf %16, %15 : vector<32x256xf32>
    %18 = arith.mulf %5, %17 : vector<32x256xf32>
    %c0_9 = arith.constant 0 : index
    %c0_10 = arith.constant 0 : index
    %19 = vector.load %arg4[%c0_9, %c0_10] : memref<256x128xf32, #tpu.memory_space<vmem>>, vector<256x128xf32>
    %cst_11 = arith.constant dense<0.000000e+00> : vector<32x128xf32>
    %20 = tpu.matmul %18, %19, %cst_11 {dimension_numbers = #tpu.dot_dimension_numbers<[1], [0], [0], [1], [0, 0, 1, 1], [], []>} : vector<32x256xf32>, vector<256x128xf32>, vector<32x128xf32> -> vector<32x128xf32>
    %c0_12 = arith.constant 0 : index
    %c0_13 = arith.constant 0 : index
    %21 = vector.load %arg5[%c0_12, %c0_13] : memref<1x128xf32, #tpu.memory_space<vmem>>, vector<1x128xf32>
    %22 = vector.broadcast %21 : vector<1x128xf32> to vector<32x128xf32>
    %23 = arith.addf %20, %22 : vector<32x128xf32>
    %24 = arith.addf %23, %0 : vector<32x128xf32>
    %c0_14 = arith.constant 0 : index
    %c0_15 = arith.constant 0 : index
    %25 = vector.load %arg6[%c0_14, %c0_15] : memref<32x128xf32, #tpu.memory_space<vmem>>, vector<32x128xf32>
    tpu.vector_store %arg6[%c0_14, %c0_15], %24 {strides = array<i32>} : memref<32x128xf32, #tpu.memory_space<vmem>>, vector<32x128xf32>,
    return
  }
  func.func @transform_0(%arg0: i32) -> (i32, i32) {
    %c0_i32 = arith.constant 0 : i32
    %c0_i32_0 = arith.constant 0 : i32
    return %arg0, %c0_i32 : i32, i32
  }
  func.func @transform_1(%arg0: i32) -> (i32, i32) {
    %c0_i32 = arith.constant 0 : i32
    %c0_i32_0 = arith.constant 0 : i32
    %c0_i32_1 = arith.constant 0 : i32
    return %c0_i32, %c0_i32_0 : i32, i32
  }
  func.func @transform_2(%arg0: i32) -> (i32, i32) {
    %c0_i32 = arith.constant 0 : i32
    %c0_i32_0 = arith.constant 0 : i32
    %c0_i32_1 = arith.constant 0 : i32
    return %c0_i32, %c0_i32_0 : i32, i32
  }
  func.func @transform_3(%arg0: i32) -> (i32, i32) {
    %c0_i32 = arith.constant 0 : i32
    %c0_i32_0 = arith.constant 0 : i32
    %c0_i32_1 = arith.constant 0 : i32
    return %c0_i32, %c0_i32_0 : i32, i32
  }
  func.func @transform_4(%arg0: i32) -> (i32, i32) {
    %c0_i32 = arith.constant 0 : i32
    %c0_i32_0 = arith.constant 0 : i32
    %c0_i32_1 = arith.constant 0 : i32
    return %c0_i32, %c0_i32_0 : i32, i32
  }
  func.func @transform_5(%arg0: i32) -> (i32, i32) {
    %c0_i32 = arith.constant 0 : i32
    %c0_i32_0 = arith.constant 0 : i32
    return %arg0, %c0_i32 : i32, i32
  }
}

</mosaic_0001>

<bundles_post_ra>
// kernel: residual_mlp.1
= control target key start
LH: loop header
LB: loop body
LE: loop exit
PB: predicated region body
PF: predicated region fallthrough
CT: control target
= control target key end

     0   :  { %10 = vsyncpa [#allocation3], 0  ;;  %s1344_s0 = inlined_call_operand.hbm [shape: f32[128,128], index: 0, kind: input, shape index: {}]   ;;  %s1345_s1 = inlined_call_operand.hbm [shape: f32[128,256], index: 1, kind: input, shape index: {}]   ;;  %s1346_s2 = inlined_call_operand.vmem [shape: f32[1,256], index: 2, kind: input, shape index: {}]   ;;  %s1347_s3 = inlined_call_operand.hbm [shape: f32[256,128], index: 3, kind: input, shape index: {}]   ;;  %s1348_s4 = inlined_call_operand.vmem [shape: f32[1,128], index: 4, kind: input, shape index: {}]   ;;  %s1349_s5 = inlined_call_operand.hbm [shape: f32[128,128], index: 5, kind: output, shape index: {}]  }
   0x1   :  { %12 = vsyncpa [#allocation3 + $0x1], 0 }
   0x2   :  { %13 = vsyncpa [#allocation6], 0 }
   0x3   :  { %14 = vsyncpa [#allocation4], 0 }
   0x4   :  { %16 = vsyncpa [#allocation4 + $0x1], 0  ;;  %s1067_s18 = smov 0   ;;  %s1069_s19 = smov 0  }
   0x5   :  { %s1071_s20 = smov 0   ;;  %s1073_s21 = smov 0  }
   0x6 LB: > { %s1088_s22 = sadd.s32 4294967295, %s1024_s21   ;;  %s721_s23 = sadd.s32 4294967294, %s1024_s21   ;;  %s1024_s21 = sphi %s1073_s21, %s1372_s21   ;;  %s1020_s20 = sphi %s1071_s20, %s1371_s20   ;;  %s1016_s19 = sphi %s1069_s19, %s1370_s19   ;;  %s1012_s18 = sphi %s1067_s18, %s1369_s18  }
   0x7   : > { %p42_p0 = scmp.ne.s32.totalorder %s1016_s19, %s1012_s18  ;;  %p1350_p1 = scmp.eq.s32.totalorder %s1088_s22, 0 }
   0x8   : > { %p156_p3 = scmp.eq.s32.totalorder %s721_s23, 3  ;;  %p722_p5 = scmp.ge.s32.totalorder %s1024_s21, 1 }
   0x9   : > { %p1097_p4 = por %p1350_p1, %p42_p0  ;;  %p163_p7 = scmp.lt.s32.totalorder %s1024_s21, 5 }
   0xa   : > { %p1102_p6 = por %p156_p3, %p42_p0  ;;  %s1026_s27 = smov [#allocation5]  }
   0xb   : > { %s1355_s24 = scalar_select %p1097_p4, 1, 0 }
   0xc   : > { %s1356_s25 = scalar_select %p1102_p6, 1, 0 }
   0xd   : > { %p1107_p8 = pnand %p722_p5, %p163_p7  ;;  %s175_s28 = sshll.u32 %s1026_s27, 4  ;;  %s176_s28 = int_to_ptr.vmem [resolvable:$true] %s175_s28 }
   0xe   : > { %s1027_s30 = smov [#allocation7]   ;;  %s887_s7 = scalar_lea.vmem %s176_s28, 4096 }
   0xf   : > { %s1357_s26 = scalar_select %p1107_p8, 1, 0 }
  0x10   : > { %p798_p9 = pneg %p1107_p8  ;;  %s191_s6 = sshll.u32 %s1027_s30, 4  ;;  %s192_s6 = int_to_ptr.vmem [resolvable:$true] %s191_s6 }
  0x11   : > { %p888_p12 = scmp.ne.s32.totalorder %s176_s28, %s887_s7  ;;  %p895_p3 = scmp.lt.s32.totalorder %s176_s28, %s176_s28 }
  0x12   : > { %p1115_p10 = pnand %p798_p9, %p1350_p1  ;;  %p896_p5 = scmp.lt.s32.totalorder %s887_s7, %s887_s7 }
  0x14   : > { %p878_p11 = pneg %p1115_p10  ;;  %p897_p7 = por %p896_p5, %p895_p3 }
  0x16   : > { %p890_p13 = pnand %p888_p12, %p878_p11 }
  0x18   : > { %p891_p0 = pneg %p890_p13 }
  0x1a   : > { %p898_p9 = pnand %p897_p7, %p891_p0 }
  0x1c   : > { %901 = shalt.err (!%p898_p9)
}
  0x1d   : > { %s1028_s8 = smov 256   ;;  %s1029_s9 = smov 16  }
  0x1e   : > { %801 = dma.hbm_to_vmem [thread:$0]  (!%p1115_p10), %s1345_s1, 4096, %s176_s28, [#allocation6], %s1028_s8, %s1028_s8, %s1029_s9  }
  0x1f   : > { %s913_s12 = scalar_lea.vmem %s192_s6, 4096  ;;  %p921_p2 = scmp.lt.s32.totalorder %s192_s6, %s192_s6 }
  0x20   : > { %p914_p1 = scmp.ne.s32.totalorder %s192_s6, %s913_s12  ;;  %p922_p6 = scmp.lt.s32.totalorder %s913_s12, %s913_s12 }
  0x22   : > { %p916_p12 = pnand %p914_p1, %p878_p11  ;;  %p923_p3 = por %p922_p6, %p921_p2 }
  0x24   : > { %p917_p13 = pneg %p916_p12 }
  0x26   : > { %p924_p0 = pnand %p923_p3, %p917_p13 }
  0x28   : > { %927 = shalt.err (!%p924_p0)
}
  0x29   : > { %s1351_s13 = smov 128   ;;  %s1031_s14 = smov 8  }
  0x2a   : > { %804 = dma.hbm_to_vmem [thread:$0]  (!%p1115_p10), %s1347_s3, 4096, %s192_s6, [#allocation6], %s1351_s13, %s1351_s13, %s1031_s14  }
  0x2b   : > { %s1141_s17 = sadd.s32 1, %s1024_s21   ;;  %s29_s27 = sadd.s32 1, %s1020_s20 }
  0x2c   : > { %s26_s23 = ssub.s32 %s1024_s21, %s1141_s17  ;;  %p36_p2 = scmp.ne.s32.totalorder %s1020_s20, %s1016_s19 }
  0x2d   : > { %p27_p1 = scmp.eq.s32.totalorder %s26_s23, 0  ;;  %p37_p6 = scmp.eq.s32.totalorder %s1024_s21, 0 }
  0x2e   : > { %p1359_p5 = scmp.eq.s32.totalorder %s1088_s22, 3  ;;  %p815_p9 = scmp.lt.s32.totalorder %s1024_s21, 4 }
  0x2f   : > { %s1150_s28 = scalar_select %p27_p1, %s1020_s20, %s29_s27  }
  0x30   : > { %p38_p11 = por %p37_p6, %p36_p2  ;;  %p1154_p7 = por %p1359_p5, %p36_p2 }
  0x31   : > { %s208_s30 = sand.u32 1, %s1020_s20   ;;  %s740_s6 = sshll.u32 %s1024_s21, 9 }
  0x32   : > { %s1360_s29 = scalar_select %p1154_p7, 1, 0 }
  0x33   : > { %s726_s7 = sshll.u32 %s208_s30, 5  ;;  %s1164_s10 = scalar_lea.hbm %s1344_s0, %s740_s6 }
  0x34   : > { %s212_s11 = scalar_lea.vmem [#allocation2], %s726_s7  ;;  %p1168_p10 = pnand %p815_p9, %p38_p11 }
  0x35   : > { %s219_s12 = sshll.u32 %s212_s11, 4  ;;  %s1172_s16 = scalar_lea.sflag [#allocation3], %s208_s30  ;;  %s1166_s12 = int_to_ptr.vmem [resolvable:$true] %s219_s12 }
  0x36   : > { %s928_s23 = scalar_lea.hbm %s1164_s10, 512  ;;  %p930_p13 = pneg %p1168_p10 }
  0x37   : > { %p929_p12 = scmp.ne.s32.totalorder %s1164_s10, %s928_s23  ;;  %s933_s7 = scalar_lea.hbm %s1344_s0, 2048 }
  0x38   : > { %p934_p1 = scmp.lt.s32.totalorder %s1164_s10, %s1344_s0  ;;  %p935_p2 = scmp.lt.s32.totalorder %s933_s7, %s928_s23 }
  0x39   : > { %p931_p3 = pnand %p930_p13, %p929_p12 }
  0x3a   : > { %p936_p6 = por %p935_p2, %p934_p1 }
  0x3b   : > { %p932_p0 = pneg %p931_p3 }
  0x3d   : > { %p937_p11 = pnand %p936_p6, %p932_p0 }
  0x3f   : > { %940 = shalt.err (!%p937_p11)
}
  0x40   : > { %s941_s30 = scalar_lea.vmem %s1166_s12, 512  ;;  %s1032_s11 = smov [#allocation2]  }
  0x41   : > { %p942_p5 = scmp.ne.s32.totalorder %s1166_s12, %s941_s30  ;;  %s946_s13 = sshll.u32 %s1032_s11, 4  ;;  %s947_s13 = int_to_ptr.vmem [resolvable:$false] %s946_s13 }
  0x42   : > { %s948_s27 = scalar_lea.vmem %s947_s13, 1024  ;;  %p949_p3 = scmp.lt.s32.totalorder %s1166_s12, %s947_s13 }
  0x43   : > { %p944_p9 = pnand %p942_p5, %p930_p13  ;;  %p950_p7 = scmp.lt.s32.totalorder %s948_s27, %s941_s30 }
  0x45   : > { %p945_p12 = pneg %p944_p9  ;;  %p951_p4 = por %p950_p7, %p949_p3 }
  0x47   : > { %p952_p8 = pnand %p951_p4, %p945_p12 }
  0x49   : > { %955 = shalt.err (!%p952_p8)
}
  0x4a   : > { %s1362_s23 = smov 128   ;;  %p1363_p13 = scmp.ne.s32.totalorder %s1357_s26, 0 }
  0x4b   : > { %808 = dma.hbm_to_vmem [thread:$0]  (!%p1168_p10), %s1164_s10, 512, %s1166_s12, %s1172_s16, %s1362_s23, %s1362_s23, %s1031_s14  }
  0x4c   : > { %231 = sbr.rel (%p1363_p13) target bundleno = 574 (0x23e), region = 40  ;;  %s1199_s6 = sand.u32 (!%p1363_p13), 1, %s1016_s19  }
  0x4d   : > { %s730_s13 = sshll.u32 (!%p1363_p13), %s1199_s6, 5  ;;  %s234_s7 = scalar_lea.sflag (!%p1363_p13), [#allocation3], %s1199_s6 }
  0x4e   : > { %s1205_s15 = scalar_lea.vmem (!%p1363_p13), [#allocation2], %s730_s13  ;;  %p1364_p4 = scmp.ne.s32.totalorder (!%p1363_p13), %s1355_s24, 0 }
  0x51   : > { %999 = dma.done.wait (%p1364_p4), %s234_s7, 512  }
  0x52   : > { %1001 = vsyncadd (%p1364_p4), %s234_s7, 4294966784  ;;  %p1365_p8 = scmp.eq.s32.totalorder %s1088_s22, 0 }
  0x54   : > { %1003 = dma.done.wait (%p1365_p8), [#allocation6], 8192   ;;  %p1366_p7 = pmov %p1365_p8 }
  0x55   : > { %v1033_v0 = vmov 0.0   ;;  %v309_v1 = vld [vmem:[#allocation5 + $0xf8] sm:$0xff]  ;;  %v308_v2 = vld [vmem:[#allocation5 + $0xf0] sm:$0xff]  ;;  %v307_v3 = vld [vmem:[#allocation5 + $0xe8] sm:$0xff]  ;;  %s271_s12 = scalar_lea.vmem [#allocation8], %s730_s13  ;;  %s741_s8 = sshll.u32 %s1088_s22, 9 }
  0x56   : > { %1005 = vsyncadd (%p1366_p7), [#allocation6], 4294959104  ;;  %386 = vmatprep.mubr.f32.mxu0 %v1033_v0  ;;  %322 = vmatprep.subr.mxu0 %v309_v1  ;;  %v306_v4 = vld [vmem:[#allocation5 + $0xe0] sm:$0xff]  ;;  %v305_v5 = vld [vmem:[#allocation5 + $0xd8] sm:$0xff]  ;;  %s629_s16 = sshll.u32 %s271_s12, 4  ;;  %s1301_s11 = scalar_lea.hbm %s1349_s5, %s741_s8  ;;  %s1296_s16 = int_to_ptr.vmem [resolvable:$true] %s629_s16 }
  0x57   : > { %323 = vmatpush1.msra.mxu0 %v308_v2  ;;  %v304_v6 = vld [vmem:[#allocation5 + $0xd0] sm:$0xff]  ;;  %v303_v7 = vld [vmem:[#allocation5 + $0xc8] sm:$0xff]  ;;  %v302_v8 = vld [vmem:[#allocation5 + $0xc0] sm:$0xff]  ;;  %s616_s27 = scalar_lea.sflag [#allocation4], %s1199_s6  ;;  %s956_s23 = scalar_lea.vmem %s1296_s16, 512 }
  0x58   : > { %324 = vmatprep.subr.mxu0 %v307_v3  ;;  %v301_v9 = vld [vmem:[#allocation5 + $0xb8] sm:$0xff]  ;;  %v300_v10 = vld [vmem:[#allocation5 + $0xb0] sm:$0xff]  ;;  %v299_v11 = vld [vmem:[#allocation5 + $0xa8] sm:$0xff]  ;;  %p957_p10 = scmp.ne.s32.totalorder %s1296_s16, %s956_s23  ;;  %p1367_p0 = scmp.ne.s32.totalorder %s1360_s29, 0 }
  0x59   : > { %325 = vmatpush1.msra.mxu0 %v306_v4  ;;  %v298_v12 = vld [vmem:[#allocation5 + $0xa0] sm:$0xff]  ;;  %v297_v13 = vld [vmem:[#allocation5 + $0x98] sm:$0xff]  ;;  %v296_v14 = vld [vmem:[#allocation5 + $0x90] sm:$0xff]  ;;  %s1034_s22 = smov [#allocation8]  }
  0x5a   : > { %326 = vmatprep.subr.mxu0 %v305_v5  ;;  %v295_v15 = vld [vmem:[#allocation5 + $0x88] sm:$0xff]  ;;  %v294_v16 = vld [vmem:[#allocation5 + $0x80] sm:$0xff]  ;;  %v293_v17 = vld [vmem:[#allocation5 + $0x78] sm:$0xff]  ;;  %v312_v5 = vlaneseq  ;;  %p958_p1 = pnand %p957_p10, %p1367_p0  ;;  %s960_s13 = sshll.u32 %s1034_s22, 4  ;;  %s961_s13 = int_to_ptr.vmem [resolvable:$false] %s960_s13 }
  0x5b   : > { %327 = vmatpush1.msra.mxu0 %v304_v6  ;;  %v292_v18 = vld [vmem:[#allocation5 + $0x70] sm:$0xff]  ;;  %v291_v19 = vld [vmem:[#allocation5 + $0x68] sm:$0xff]  ;;  %v290_v20 = vld [vmem:[#allocation5 + $0x60] sm:$0xff]  ;;  %s962_s7 = scalar_lea.vmem %s961_s13, 1024  ;;  %p963_p6 = scmp.lt.s32.totalorder %s1296_s16, %s961_s13 }
  0x5c   : > { %328 = vmatprep.subr.mxu0 %v303_v7  ;;  %v289_v21 = vld [vmem:[#allocation5 + $0x58] sm:$0xff]  ;;  %v288_v22 = vld [vmem:[#allocation5 + $0x50] sm:$0xff]  ;;  %v287_v23 = vld [vmem:[#allocation5 + $0x48] sm:$0xff]  ;;  %v313_v6 = vshrl.u32 %v312_v5, 7  ;;  %p959_p2 = pneg %p958_p1  ;;  %p964_p11 = scmp.lt.s32.totalorder %s962_s7, %s956_s23 }
  0x5d   : > { %329 = vmatpush1.msra.mxu0 %v302_v8  ;;  %v286_v24 = vld [vmem:[#allocation5 + $0x40] sm:$0xff]  ;;  %v285_v25 = vld [vmem:[#allocation5 + $0x38] sm:$0xff]  ;;  %v284_v26 = vld [vmem:[#allocation5 + $0x30] sm:$0xff] }
  0x5e   : > { %330 = vmatprep.subr.mxu0 %v301_v9  ;;  %v283_v27 = vld [vmem:[#allocation5 + $0x28] sm:$0xff]  ;;  %v282_v28 = vld [vmem:[#allocation5 + $0x20] sm:$0xff]  ;;  %v281_v29 = vld [vmem:[#allocation5 + $0x18] sm:$0xff]  ;;  %v314_v7 = vsub.s32 0, %v313_v6  ;;  %v318_v9 = vsub.s32 1, %v313_v6  ;;  %p965_p5 = por %p964_p11, %p963_p6 }
  0x5f   : > { %331 = vmatpush1.msra.mxu0 %v300_v10  ;;  %v280_v30 = vld [vmem:[#allocation5 + $0x10] sm:$0xff]  ;;  %v279_v31 = vld [vmem:[#allocation5 + $0x8] sm:$0xff]  ;;  %v278_v32 = vld [vmem:[#allocation5] sm:$0xff] }
  0x60   : > { %332 = vmatprep.subr.mxu0 %v299_v11  ;;  %v1217_v33 = vld [vmem:[%s1205_s15] sm:$0xff]  ;;  %v1222_v34 = vld [vmem:[%s1205_s15 + $0x8] sm:$0xff]  ;;  %v1227_v35 = vld [vmem:[%s1205_s15 + $0x10] sm:$0xff]  ;;  %p966_p9 = pnand %p965_p5, %p959_p2 }
  0x61   : > { %333 = vmatpush1.msra.mxu0 %v298_v12  ;;  %v1232_v36 = vld [vmem:[%s1205_s15 + $0x18] sm:$0xff]  ;;  %v513_v39 = vld [vmem:[#allocation7 + $0xf0] sm:$0xff]  ;;  %v512_v41 = vld [vmem:[#allocation7 + $0xe8] sm:$0xff] }
  0x62   : > { %334 = vmatprep.subr.mxu0 %v297_v13  ;;  %v514_v37 = vld [vmem:[#allocation7 + $0xf8] sm:$0xff]  ;;  %v497_v40 = vld [vmem:[#allocation7 + $0x70] sm:$0xff]  ;;  %v496_v42 = vld [vmem:[#allocation7 + $0x68] sm:$0xff] }
  0x63   : > { %335 = vmatpush1.msra.mxu0 %v296_v14  ;;  %742 = vmatprep.subr.mxu1 %v514_v37  ;;  %v498_v38 = vld [vmem:[#allocation7 + $0x78] sm:$0xff]  ;;  %v511_v43 = vld [vmem:[#allocation7 + $0xe0] sm:$0xff]  ;;  %v509_v47 = vld [vmem:[#allocation7 + $0xd0] sm:$0xff] }
  0x64   : > { %336 = vmatprep.subr.mxu0 %v295_v15  ;;  %743 = vmatpush3.msra.mxu1 %v498_v38  ;;  %v495_v44 = vld [vmem:[#allocation7 + $0x60] sm:$0xff]  ;;  %v510_v45 = vld [vmem:[#allocation7 + $0xd8] sm:$0xff]  ;;  %v493_v48 = vld [vmem:[#allocation7 + $0x50] sm:$0xff] }
  0x65   : > { %337 = vmatpush1.msra.mxu0 %v294_v16  ;;  %744 = vmatprep.subr.mxu1 %v513_v39  ;;  %v494_v46 = vld [vmem:[#allocation7 + $0x58] sm:$0xff]  ;;  %v508_v49 = vld [vmem:[#allocation7 + $0xc8] sm:$0xff]  ;;  %v507_v51 = vld [vmem:[#allocation7 + $0xc0] sm:$0xff] }
  0x66   : > { %338 = vmatprep.subr.mxu0 %v293_v17  ;;  %745 = vmatpush3.msra.mxu1 %v497_v40  ;;  %v492_v50 = vld [vmem:[#allocation7 + $0x48] sm:$0xff]  ;;  %v491_v52 = vld [vmem:[#allocation7 + $0x40] sm:$0xff]  ;;  %v506_v53 = vld [vmem:[#allocation7 + $0xb8] sm:$0xff] }
  0x67   : > { %339 = vmatpush1.msra.mxu0 %v292_v18  ;;  %746 = vmatprep.subr.mxu1 %v512_v41  ;;  %v490_v54 = vld [vmem:[#allocation7 + $0x38] sm:$0xff]  ;;  %v505_v55 = vld [vmem:[#allocation7 + $0xb0] sm:$0xff]  ;;  %v504_v57 = vld [vmem:[#allocation7 + $0xa8] sm:$0xff] }
  0x68   : > { %340 = vmatprep.subr.mxu0 %v291_v19  ;;  %747 = vmatpush3.msra.mxu1 %v496_v42  ;;  %v489_v56 = vld [vmem:[#allocation7 + $0x30] sm:$0xff]  ;;  %v488_v58 = vld [vmem:[#allocation7 + $0x28] sm:$0xff]  ;;  %v503_v59 = vld [vmem:[#allocation7 + $0xa0] sm:$0xff] }
  0x69   : > { %341 = vmatpush1.msra.mxu0 %v290_v20  ;;  %748 = vmatprep.subr.mxu1 %v511_v43  ;;  %v487_v60 = vld [vmem:[#allocation7 + $0x20] sm:$0xff]  ;;  %v502_v61 = vld [vmem:[#allocation7 + $0x98] sm:$0xff]  ;;  %v501_v63 = vld [vmem:[#allocation7 + $0x90] sm:$0xff] }
  0x6a   : > { %342 = vmatprep.subr.mxu0 %v289_v21  ;;  %749 = vmatpush3.msra.mxu1 %v495_v44  ;;  %v486_v62 = vld [vmem:[#allocation7 + $0x18] sm:$0xff]  ;;  %v500_v1 = vld [vmem:[#allocation7 + $0x88] sm:$0xff]  ;;  %v499_v3 = vld [vmem:[#allocation7 + $0x80] sm:$0xff] }
  0x6b   : > { %343 = vmatpush1.msra.mxu0 %v288_v22  ;;  %750 = vmatprep.subr.mxu1 %v510_v45  ;;  %v484_v2 = vld [vmem:[#allocation7 + $0x8] sm:$0xff]  ;;  %v483_v4 = vld [vmem:[#allocation7] sm:$0xff] }
  0x6c   : > { %344 = vmatprep.subr.mxu0 %v287_v23  ;;  %751 = vmatpush3.msra.mxu1 %v494_v46  ;;  %v310_v8 = vld [vmem:[%s1346_s2] sm:$0x3] }
  0x6d   : > { %345 = vmatpush1.msra.mxu0 %v286_v24  ;;  %752 = vmatprep.subr.mxu1 %v509_v47  ;;  %v315_v10 = vrot.slane %v310_v8, %v314_v7  ;;  %v319_v11 = vrot.slane %v310_v8, %v318_v9 }
  0x6e   : > { %346 = vmatprep.subr.mxu0 %v285_v25  ;;  %753 = vmatpush3.msra.mxu1 %v493_v48 }
  0x6f   : > { %347 = vmatpush1.msra.mxu0 %v284_v26  ;;  %754 = vmatprep.subr.mxu1 %v508_v49 }
  0x70   : > { %348 = vmatprep.subr.mxu0 %v283_v27  ;;  %755 = vmatpush3.msra.mxu1 %v492_v50 }
  0x71   : > { %349 = vmatpush1.msra.mxu0 %v282_v28  ;;  %756 = vmatprep.subr.mxu1 %v507_v51 }
  0x72   : > { %350 = vmatprep.subr.mxu0 %v281_v29  ;;  %757 = vmatpush3.msra.mxu1 %v491_v52 }
  0x73   : > { %351 = vmatpush1.msra.mxu0 %v280_v30  ;;  %758 = vmatprep.subr.mxu1 %v506_v53 }
  0x74   : > { %352 = vmatprep.subr.mxu0 %v279_v31  ;;  %759 = vmatpush3.msra.mxu1 %v490_v54 }
  0x75   : > { %353 = vmatpush1.msra.mxu0 %v278_v32  ;;  %760 = vmatprep.subr.mxu1 %v505_v55 }
  0x76   : > { %387 = vmatmul.mubr.f32.vlgmr.msra.gmra.mxu0 %v1217_v33  ;;  %761 = vmatpush3.msra.mxu1 %v489_v56 }
  0x77   : > { %392 = vmatprep.mubr.f32.mxu0 %v1033_v0  ;;  %762 = vmatprep.subr.mxu1 %v504_v57 }
  0x78   : > { %763 = vmatpush3.msra.mxu1 %v488_v58 }
  0x79   : > { %764 = vmatprep.subr.mxu1 %v503_v59 }
  0x7a   : > { %393 = vmatmul.mubr.f32.gmra.mxu0 %v1222_v34  ;;  %765 = vmatpush3.msra.mxu1 %v487_v60 }
  0x7b   : > { %398 = vmatprep.mubr.f32.mxu0 %v1033_v0  ;;  %766 = vmatprep.subr.mxu1 %v502_v61 }
  0x7c   : > { %767 = vmatpush3.msra.mxu1 %v486_v62 }
  0x7d   : > { %768 = vmatprep.subr.mxu1 %v501_v63 }
  0x7e   : > { %399 = vmatmul.mubr.f32.gmra.mxu0 %v1227_v35 }
  0x7f   : > { %404 = vmatprep.mubr.f32.mxu0 %v1033_v0  ;;  %v485_v0 = vld [vmem:[#allocation7 + $0x10] sm:$0xff] }
  0x80   : > { %769 = vmatpush3.msra.mxu1 %v485_v0 }
  0x81   : > { %770 = vmatprep.subr.mxu1 %v500_v1 }
  0x82   : > { %405 = vmatmul.mubr.f32.gmra.mxu0 %v1232_v36  ;;  %771 = vmatpush3.msra.mxu1 %v484_v2 }
  0x83   : > { %772 = vmatprep.subr.mxu1 %v499_v3 }
  0x84   : > { %773 = vmatpush3.msra.mxu1 %v483_v4 }
 0x136   : > { %v388_v12 = vpop.f32.mrf.mxu0 }
 0x137   : > { %v1238_v13 = vadd.f32 %v388_v12, %v315_v10 }
 0x138   : > { %v390_v14 = vpop.f32.mrf.mxu0 }
 0x139   : > { %v411_v15 = vmul.f32 %v1238_v13, %v1238_v13  ;;  %v1242_v16 = vadd.f32 %v390_v14, %v319_v11 }
 0x13a   : > { %v394_v17 = vpop.f32.mrf.mxu0 }
 0x13b   : > { %v419_v18 = vmul.f32 %v411_v15, %v1238_v13  ;;  %v412_v19 = vmul.f32 %v1242_v16, %v1242_v16  ;;  %v1247_v20 = vadd.f32 %v394_v17, %v315_v10 }
 0x13c   : > { %v396_v21 = vpop.f32.mrf.mxu0 }
 0x13d   : > { %v427_v22 = vmul.f32 0.044715, %v419_v18  ;;  %v420_v23 = vmul.f32 %v412_v19, %v1242_v16  ;;  %v413_v24 = vmul.f32 %v1247_v20, %v1247_v20  ;;  %v1252_v25 = vadd.f32 %v396_v21, %v319_v11 }
 0x13e   : > { %v400_v26 = vpop.f32.mrf.mxu0 }
 0x13f   : > { %v435_v27 = vadd.f32 %v427_v22, %v1238_v13  ;;  %v421_v28 = vmul.f32 %v413_v24, %v1247_v20  ;;  %v414_v29 = vmul.f32 %v1252_v25, %v1252_v25  ;;  %v1258_v30 = vadd.f32 %v400_v26, %v315_v10 }
 0x140   : > { %v402_v31 = vpop.f32.mrf.mxu0  ;;  %v428_v32 = vmul.f32 0.044715, %v420_v23 }
 0x141   : > { %v443_v37 = vmul.f32 0.7978846, %v435_v27  ;;  %v429_v38 = vmul.f32 0.044715, %v421_v28  ;;  %v422_v39 = vmul.f32 %v414_v29, %v1252_v25  ;;  %v415_v40 = vmul.f32 %v1258_v30, %v1258_v30 }
 0x142   : > { %v1263_v41 = vadd.f32 %v402_v31, %v319_v11  ;;  %v406_v42 = vpop.f32.mrf.mxu0  ;;  %v436_v43 = vadd.f32 %v428_v32, %v1242_v16 }
 0x143   : > { %860 = vtanh.f32 %v443_v37  ;;  %v437_v44 = vadd.f32 %v429_v38, %v1247_v20  ;;  %v430_v45 = vmul.f32 0.044715, %v422_v39  ;;  %v423_v46 = vmul.f32 %v415_v40, %v1258_v30 }
 0x144   : > { %v416_v47 = vmul.f32 %v1263_v41, %v1263_v41  ;;  %v1270_v48 = vadd.f32 %v406_v42, %v315_v10  ;;  %v408_v49 = vpop.f32.mrf.mxu0  ;;  %v444_v50 = vmul.f32 0.7978846, %v436_v43 }
 0x145   : > { %v445_v51 = vmul.f32 0.7978846, %v437_v44  ;;  %v438_v52 = vadd.f32 %v430_v45, %v1252_v25  ;;  %v431_v53 = vmul.f32 0.044715, %v423_v46  ;;  %v409_v54 = vadd.f32 %v408_v49, %v319_v11 }
 0x146   : > { %v424_v55 = vmul.f32 %v416_v47, %v1263_v41  ;;  %v417_v56 = vmul.f32 %v1270_v48, %v1270_v48  ;;  %862 = vtanh.f32 %v444_v50  ;;  %v734_v47 = vld [vmem:[%s1348_s4] ss:$0 sm:$0xff] }
 0x147   : > { %864 = vtanh.f32 %v445_v51  ;;  %v446_v57 = vmul.f32 0.7978846, %v438_v52  ;;  %v439_v58 = vadd.f32 %v431_v53, %v1258_v30  ;;  %v418_v59 = vmul.f32 %v409_v54, %v409_v54 }
 0x148   : > { %v432_v60 = vmul.f32 0.044715, %v424_v55  ;;  %v425_v61 = vmul.f32 %v417_v56, %v1270_v48 }
 0x149   : > { %866 = vtanh.f32 %v446_v57  ;;  %v447_v62 = vmul.f32 0.7978846, %v439_v58  ;;  %v426_v63 = vmul.f32 %v418_v59, %v409_v54 }
 0x14a   : > { %v440_v0 = vadd.f32 %v432_v60, %v1263_v41  ;;  %v433_v1 = vmul.f32 0.044715, %v425_v61 }
 0x14b   : > { %868 = vtanh.f32 %v447_v62  ;;  %v434_v2 = vmul.f32 0.044715, %v426_v63 }
 0x14c   : > { %v448_v3 = vmul.f32 0.7978846, %v440_v0  ;;  %v441_v4 = vadd.f32 %v433_v1, %v1270_v48 }
 0x14d   : > { %v442_v5 = vadd.f32 %v434_v2, %v409_v54 }
 0x14e   : > { %870 = vtanh.f32 %v448_v3  ;;  %v449_v6 = vmul.f32 0.7978846, %v441_v4 }
 0x14f   : > { %v450_v7 = vmul.f32 0.7978846, %v442_v5 }
 0x150   : > { %v861_v8 = vpop.eup %860  ;;  %872 = vtanh.f32 %v449_v6 }
 0x151   : > { %874 = vtanh.f32 %v450_v7  ;;  %v459_v9 = vadd.f32 1.0, %v861_v8 }
 0x153   : > { %v863_v10 = vpop.eup %862  ;;  %v467_v14 = vmul.f32 0.5, %v459_v9 }
 0x154   : > { %v865_v11 = vpop.eup %864  ;;  %v460_v12 = vadd.f32 1.0, %v863_v10 }
 0x155   : > { %v461_v15 = vadd.f32 1.0, %v865_v11  ;;  %v475_v23 = vmul.f32 %v467_v14, %v1238_v13 }
 0x156   : > { %v867_v17 = vpop.eup %866  ;;  %v468_v18 = vmul.f32 0.5, %v460_v12 }
 0x157   : > { %v462_v19 = vadd.f32 1.0, %v867_v17  ;;  %v469_v26 = vmul.f32 0.5, %v461_v15 }
 0x158   : > { %v869_v21 = vpop.eup %868  ;;  %v476_v22 = vmul.f32 %v468_v18, %v1242_v16 }
 0x159   : > { %v470_v24 = vmul.f32 0.5, %v462_v19  ;;  %v463_v27 = vadd.f32 1.0, %v869_v21  ;;  %v477_v37 = vmul.f32 %v469_v26, %v1247_v20 }
 0x15a   : > { %586 = vmatprep.mubr.f32.mxu1 %v476_v22 }
 0x15b   : > { %v871_v28 = vpop.eup %870  ;;  %587 = vmatmul.mubr.f32.vlgmr.msra.gmra.mxu1 %v475_v23  ;;  %v478_v29 = vmul.f32 %v470_v24, %v1252_v25  ;;  %v471_v38 = vmul.f32 0.5, %v463_v27 }
 0x15c   : > { %v464_v31 = vadd.f32 1.0, %v871_v28 }
 0x15d   : > { %v873_v32 = vpop.eup %872  ;;  %591 = vmatprep.mubr.f32.mxu1 %v478_v29  ;;  %v479_v43 = vmul.f32 %v471_v38, %v1258_v30 }
 0x15e   : > { %v875_v39 = vpop.eup %874  ;;  %v472_v40 = vmul.f32 0.5, %v464_v31  ;;  %v465_v42 = vadd.f32 1.0, %v873_v32 }
 0x15f   : > { %592 = vmatmul.mubr.f32.gmra.mxu1 %v477_v37  ;;  %v466_v16 = vadd.f32 1.0, %v875_v39 }
 0x160   : > { %v480_v13 = vmul.f32 %v472_v40, %v1263_v41  ;;  %v473_v45 = vmul.f32 0.5, %v465_v42 }
 0x161   : > { %v474_v44 = vmul.f32 0.5, %v466_v16 }
 0x162   : > { %596 = vmatprep.mubr.f32.mxu1 %v480_v13  ;;  %v481_v46 = vmul.f32 %v473_v45, %v1270_v48 }
 0x163   : > { %597 = vmatmul.mubr.f32.gmra.mxu1 %v479_v43  ;;  %v482_v25 = vmul.f32 %v474_v44, %v409_v54 }
 0x165   : > { %601 = vmatprep.mubr.f32.mxu1 %v482_v25 }
 0x167   : > { %602 = vmatmul.mubr.f32.gmra.mxu1 %v481_v46 }
 0x21b   : > { %v774_v20 = vpop.f32.mrf.mxu1 }
 0x21d   : > { %v775_v49 = vpop.f32.mrf.mxu1 }
 0x21e   : > { %v776_v50 = vadd.f32 %v775_v49, %v774_v20 }
 0x21f   : > { %v777_v41 = vpop.f32.mrf.mxu1 }
 0x220   : > { %v589_v51 = vadd.f32 %v776_v50, %v734_v47 }
 0x221   : > { %v778_v30 = vpop.f32.mrf.mxu1 }
 0x222   : > { %v607_v52 = vadd.f32 %v589_v51, %v1217_v33  ;;  %v779_v53 = vadd.f32 %v778_v30, %v777_v41 }
 0x223   : > { %v780_v55 = vpop.f32.mrf.mxu1 }
 0x224   : > { %611 = vst [vmem:[%s271_s12] sm:$0xff] %v607_v52  ;;  %v594_v48 = vadd.f32 %v779_v53, %v734_v47 }
 0x225   : > { %v781_v54 = vpop.f32.mrf.mxu1 }
 0x226   : > { %v608_v56 = vadd.f32 %v594_v48, %v1222_v34  ;;  %v782_v57 = vadd.f32 %v781_v54, %v780_v55 }
 0x227   : > { %v783_v58 = vpop.f32.mrf.mxu1 }
 0x228   : > { %612 = vst [vmem:[%s271_s12 + $0x8] sm:$0xff] %v608_v56  ;;  %v599_v59 = vadd.f32 %v782_v57, %v734_v47 }
 0x229   : > { %v784_v60 = vpop.f32.mrf.mxu1 }
 0x22a   : > { %v609_v33 = vadd.f32 %v599_v59, %v1227_v35  ;;  %v785_v61 = vadd.f32 %v784_v60, %v783_v58 }
 0x22c   : > { %613 = vst [vmem:[%s271_s12 + $0x10] sm:$0xff] %v609_v33  ;;  %v604_v62 = vadd.f32 %v785_v61, %v734_v47 }
 0x22e   : > { %v610_v34 = vadd.f32 %v604_v62, %v1232_v36 }
 0x230   : > { %614 = vst [vmem:[%s271_s12 + $0x18] sm:$0xff] %v610_v34 }
 0x231   : > { %969 = shalt.err (!%p966_p9)
}
 0x232   : > { %s970_s15 = scalar_lea.hbm %s1301_s11, 512  ;;  %s974_s14 = scalar_lea.hbm %s1349_s5, 2048 }
 0x233   : > { %p971_p12 = scmp.ne.s32.totalorder %s1301_s11, %s970_s15  ;;  %p975_p4 = scmp.lt.s32.totalorder %s1301_s11, %s1349_s5 }
 0x234   : > { %p976_p8 = scmp.lt.s32.totalorder %s974_s14, %s970_s15 }
 0x235   : > { %p972_p3 = pnand %p971_p12, %p1367_p0 }
 0x236   : > { %p977_p7 = por %p976_p8, %p975_p4 }
 0x237   : > { %p973_p13 = pneg %p972_p3 }
 0x239   : > { %p978_p10 = pnand %p977_p7, %p973_p13 }
 0x23b   : > { %981 = shalt.err (!%p978_p10)
}
 0x23c   : > { %s1035_s8 = smov 128   ;;  %s1036_s9 = smov 8  }
 0x23d   : > { %796 = dma.vmem_to_hbm [thread:$0]  (%p1367_p0), %s1296_s16, 512, %s1301_s11, %s616_s27, %s1035_s8, %s1035_s8, %s1036_s9  }
 0x23e PF: > { %p818_p1 = scmp.ge.s32.totalorder %s1024_s21, 2  ;;  %s644_s30 = sand.u32 1, %s1012_s18  }
 0x23f   : > { %p1368_p2 = scmp.ne.s32.totalorder %s1356_s25, 0  ;;  %s645_s23 = scalar_lea.sflag [#allocation4], %s644_s30 }
 0x241   : > { %p810_p6 = pnand %p818_p1, %p1368_p2 }
 0x243   : > { %p811_p11 = pneg %p810_p6 }
 0x245   : > { %1007 = dma.done.wait (%p811_p11), %s645_s23, 512  }
 0x246   : > { %1009 = vsyncadd (%p811_p11), %s645_s23, 4294966784  ;;  %p19_p5 = scmp.ge.s32.totalorder %s1141_s17, 6   ;;  %s1369_s18 = smov %s1016_s19 }
 0x247   : > { %s1370_s19 = smov %s1020_s20  ;;  %s1371_s20 = smov %s1150_s28 }
 0x248   : > { %s1372_s21 = smov %s1141_s17  ;;  %21 = sbr.rel (!%p19_p5) target bundleno = 6 (0x6), region = 93 }
 0x24d   :  { %650 = vsyncpa [#allocation3], 1 }
 0x24e   :  { %652 = vsyncpa [#allocation3 + $0x1], 1 }
 0x24f   :  { %653 = vsyncpa [#allocation6], 1 }
 0x250   :  { %654 = vsyncpa [#allocation4], 1 }
 0x251   :  { %656 = vsyncpa [#allocation4 + $0x1], 1 }

</bundles_post_ra>
